<compile_context>
chip_gen: v5e
topology: v5e:2x2
jax: 0.10.0
libtpu: 0.0.40
codegen_flags: <defaults>
</compile_context>

<pallas_src>
import jax
import jax.numpy as jnp
from jax.experimental import pallas as pl
from jax.experimental.pallas import tpu as pltpu

# Logical dims of the PyTorch Net and the lane-padded hidden widths.
D_IN, H1, H2, H3, D_OUT = 5, 120, 120, 60, 1
H1_P, H2_P, H3_P = 128, 128, 128

_MAX_TB = 8192  # keeps (TB,128) f32 intermediates + double-buffered streams << 32 MiB


def _round_up(n, m):
    return ((n + m - 1) // m) * m


def _mlp_kernel(x_ref,
                w1_ref, b1_ref,
                w2_ref, b2_ref,
                w3_ref, b3_ref,
                w4_ref, b4_ref,
                o_ref):
    # fc1 + relu: (TB, 5) @ (5, 128) -- Mosaic pads the K=5 contraction in-regs.
    h = jnp.dot(x_ref[...], w1_ref[...], preferred_element_type=jnp.float32)
    h = jnp.maximum(h + b1_ref[...], 0.0)
    # fc2 + relu
    h = jnp.dot(h, w2_ref[...], preferred_element_type=jnp.float32)
    h = jnp.maximum(h + b2_ref[...], 0.0)
    # fc3 + relu
    h = jnp.dot(h, w3_ref[...], preferred_element_type=jnp.float32)
    h = jnp.maximum(h + b3_ref[...], 0.0)
    # fc4: single output column -> VPU multiply + XLU lane-reduce (no padded MXU matmul).
    out = jnp.sum(h * w4_ref[...], axis=-1, keepdims=True) + b4_ref[...]
    o_ref[...] = out.astype(o_ref.dtype)


def prepare_params(params):
    """Zero-pad weights/biases once to kernel layout (exact math; relu(0)=0)."""
    def pad2(a, shape):
        return jnp.zeros(shape, a.dtype).at[:a.shape[0], :a.shape[1]].set(a)
    return {
        "w1": pad2(params["w1"], (D_IN, H1_P)),       # (5, 128)
        "b1": pad2(params["b1"], (1, H1_P)),
        "w2": pad2(params["w2"], (H1_P, H2_P)),        # (128, 128)
        "b2": pad2(params["b2"], (1, H2_P)),
        "w3": pad2(params["w3"], (H2_P, H3_P)),        # (128, 128)
        "b3": pad2(params["b3"], (1, H3_P)),
        "w4": pad2(params["w4"].T, (1, H3_P)),         # (60,1) -> lane row (1, 128)
        "b4": params["b4"].reshape(1, 1).astype(jnp.float32),
    }


def net_forward(x, padded_params, *, block_b=4096, core_parallel=False):
    """x: (B, 5) float32.  padded_params: output of prepare_params()."""
    B = x.shape[0]
    # Batch tile: multiple of 8 sublanes, capped for v7x VMEM headroom.
    TB = min(_round_up(min(block_b, _MAX_TB), 8), _round_up(B, 8))
    B_pad = _round_up(B, TB)
    # Pad only remainder batch rows (feature dim untouched, no full copy of x
    # when B already divides TB).
    x_in = x if B_pad == B else jnp.pad(x, ((0, B_pad - B), (0, 0)))

    p = padded_params
    grid = (B_pad // TB,)

    # Weights / biases: same block every grid step -> VMEM-resident.
    resident = lambda a: pl.BlockSpec(a.shape, lambda i: (0, 0))

    flops = 2 * B_pad * (D_IN * H1_P + H1_P * H2_P + H2_P * H3_P + H3_P)
    bytes_accessed = 4 * (x_in.size + B_pad * D_OUT
                          + sum(int(v.size) for v in p.values()))
    cost = pl.CostEstimate(flops=flops, transcendentals=0,
                           bytes_accessed=bytes_accessed)

    # CORE_PARALLEL gives real 2-TC sharding on v7x; plain "parallel" elsewhere.
    dim_sem = (pltpu.CORE_PARALLEL,) if core_parallel else ("parallel",)

    out = pl.pallas_call(
        _mlp_kernel,
        out_shape=jax.ShapeDtypeStruct((B_pad, D_OUT), jnp.float32),
        grid=grid,
        in_specs=[pl.BlockSpec((TB, D_IN), lambda i: (i, 0)),
                  resident(p["w1"]), resident(p["b1"]),
                  resident(p["w2"]), resident(p["b2"]),
                  resident(p["w3"]), resident(p["b3"]),
                  resident(p["w4"]), resident(p["b4"])],
        out_specs=pl.BlockSpec((TB, D_OUT), lambda i: (i, 0)),
        compiler_params=pltpu.CompilerParams(
            dimension_semantics=dim_sem,
            vmem_limit_bytes=32 * 1024 * 1024),
        cost_estimate=cost,
    )(x_in, p["w1"], p["b1"], p["w2"], p["b2"], p["w3"], p["b3"], p["w4"], p["b4"])

    return out[:B]   # (B, 1); slice off batch padding only


def init_params(key):
    """nn.Linear default init: U[-1/sqrt(fan_in), 1/sqrt(fan_in)]."""
    dims = [(D_IN, H1), (H1, H2), (H2, H3), (H3, D_OUT)]
    params = {}
    for idx, (fan_in, fan_out) in enumerate(dims, start=1):
        key, kw, kb = jax.random.split(key, 3)
        bound = 1.0 / jnp.sqrt(float(fan_in))
        params[f"w{idx}"] = jax.random.uniform(
            kw, (fan_in, fan_out), jnp.float32, minval=-bound, maxval=bound)
        params[f"b{idx}"] = jax.random.uniform(
            kb, (1, fan_out), jnp.float32, minval=-bound, maxval=bound)
    return params


def _ref_forward(x, p):
    h = jnp.maximum(x @ p["w1"] + p["b1"], 0.0)
    h = jnp.maximum(h @ p["w2"] + p["b2"], 0.0)
    h = jnp.maximum(h @ p["w3"] + p["b3"], 0.0)
    return h @ p["w4"] + p["b4"]


if __name__ == "__main__":
    key = jax.random.PRNGKey(0)
    key, kx = jax.random.split(key)
    params = init_params(key)
    pparams = prepare_params(params)

    # Small batch (single tile, grid=(1,)).
    B = 8
    x = jax.random.normal(kx, (B, D_IN), jnp.float32)
    out = jax.block_until_ready(net_forward(x, pparams))
    ref = _ref_forward(x, params)
    assert out.shape == (B, 1)
    assert jnp.allclose(out, ref, atol=1e-5, rtol=1e-5)

    # Multi-tile batch grid with a remainder (grid=(3,), last tile row-padded).
    key, kx2 = jax.random.split(key)
    B2 = 40
    x2 = jax.random.normal(kx2, (B2, D_IN), jnp.float32)
    out2 = jax.block_until_ready(net_forward(x2, pparams, block_b=16))
    ref2 = _ref_forward(x2, params)
    assert out2.shape == (B2, 1)
    assert jnp.allclose(out2, ref2, atol=1e-5, rtol=1e-5)

    print("KERNEL_OK")
</pallas_src>

<mosaic_0001>
module attributes {stable_mosaic.version = 11 : i64} {
  func.func @_mlp_kernel(%arg0: i32, %arg1: memref<8x5xf32, #tpu.memory_space<vmem>>, %arg2: memref<5x128xf32, #tpu.memory_space<vmem>>, %arg3: memref<1x128xf32, #tpu.memory_space<vmem>>, %arg4: memref<128x128xf32, #tpu.memory_space<vmem>>, %arg5: memref<1x128xf32, #tpu.memory_space<vmem>>, %arg6: memref<128x128xf32, #tpu.memory_space<vmem>>, %arg7: memref<1x128xf32, #tpu.memory_space<vmem>>, %arg8: memref<1x128xf32, #tpu.memory_space<vmem>>, %arg9: memref<1x1xf32, #tpu.memory_space<vmem>>, %arg10: memref<8x1xf32, #tpu.memory_space<vmem>>) attributes {dimension_semantics = [#tpu.dimension_semantics<parallel>], iteration_bounds = array<i64: 1>, scalar_prefetch = 0 : i64, scratch_operands = 0 : i64, tpu.core_type = #tpu.core_type<tc>, window_params = [{transform_indices = @transform_0, window_bounds = array<i64: 8, 5>}, {pipeline_mode = #tpu.pipeline_mode<synchronous>, transform_indices = @transform_1, window_bounds = array<i64: 5, 128>}, {pipeline_mode = #tpu.pipeline_mode<synchronous>, transform_indices = @transform_2, window_bounds = array<i64: 1, 128>}, {pipeline_mode = #tpu.pipeline_mode<synchronous>, transform_indices = @transform_3, window_bounds = array<i64: 128, 128>}, {pipeline_mode = #tpu.pipeline_mode<synchronous>, transform_indices = @transform_4, window_bounds = array<i64: 1, 128>}, {pipeline_mode = #tpu.pipeline_mode<synchronous>, transform_indices = @transform_5, window_bounds = array<i64: 128, 128>}, {pipeline_mode = #tpu.pipeline_mode<synchronous>, transform_indices = @transform_6, window_bounds = array<i64: 1, 128>}, {pipeline_mode = #tpu.pipeline_mode<synchronous>, transform_indices = @transform_7, window_bounds = array<i64: 1, 128>}, {pipeline_mode = #tpu.pipeline_mode<synchronous>, transform_indices = @transform_8, window_bounds = array<i64: 1, 1>}, {transform_indices = @transform_9, window_bounds = array<i64: 8, 1>}]} {
    %c0 = arith.constant 0 : index
    %c0_0 = arith.constant 0 : index
    %0 = vector.load %arg1[%c0, %c0_0] : memref<8x5xf32, #tpu.memory_space<vmem>>, vector<8x5xf32>
    %c0_1 = arith.constant 0 : index
    %c0_2 = arith.constant 0 : index
    %1 = vector.load %arg2[%c0_1, %c0_2] : memref<5x128xf32, #tpu.memory_space<vmem>>, vector<5x128xf32>
    %cst = arith.constant dense<0.000000e+00> : vector<8x128xf32>
    %2 = tpu.matmul %0, %1, %cst {dimension_numbers = #tpu.dot_dimension_numbers<[1], [0], [0], [1], [0, 0, 1, 1], [], []>} : vector<8x5xf32>, vector<5x128xf32>, vector<8x128xf32> -> vector<8x128xf32>
    %c0_3 = arith.constant 0 : index
    %c0_4 = arith.constant 0 : index
    %3 = vector.load %arg3[%c0_3, %c0_4] : memref<1x128xf32, #tpu.memory_space<vmem>>, vector<1x128xf32>
    %4 = vector.broadcast %3 : vector<1x128xf32> to vector<8x128xf32>
    %5 = arith.addf %2, %4 : vector<8x128xf32>
    %cst_5 = arith.constant 0.000000e+00 : f32
    %6 = vector.broadcast %cst_5 : f32 to vector<8x128xf32>
    %7 = arith.maximumf %5, %6 : vector<8x128xf32>
    %c0_6 = arith.constant 0 : index
    %c0_7 = arith.constant 0 : index
    %8 = vector.load %arg4[%c0_6, %c0_7] : memref<128x128xf32, #tpu.memory_space<vmem>>, vector<128x128xf32>
    %cst_8 = arith.constant dense<0.000000e+00> : vector<8x128xf32>
    %9 = tpu.matmul %7, %8, %cst_8 {dimension_numbers = #tpu.dot_dimension_numbers<[1], [0], [0], [1], [0, 0, 1, 1], [], []>} : vector<8x128xf32>, vector<128x128xf32>, vector<8x128xf32> -> vector<8x128xf32>
    %c0_9 = arith.constant 0 : index
    %c0_10 = arith.constant 0 : index
    %10 = vector.load %arg5[%c0_9, %c0_10] : memref<1x128xf32, #tpu.memory_space<vmem>>, vector<1x128xf32>
    %11 = vector.broadcast %10 : vector<1x128xf32> to vector<8x128xf32>
    %12 = arith.addf %9, %11 : vector<8x128xf32>
    %cst_11 = arith.constant 0.000000e+00 : f32
    %13 = vector.broadcast %cst_11 : f32 to vector<8x128xf32>
    %14 = arith.maximumf %12, %13 : vector<8x128xf32>
    %c0_12 = arith.constant 0 : index
    %c0_13 = arith.constant 0 : index
    %15 = vector.load %arg6[%c0_12, %c0_13] : memref<128x128xf32, #tpu.memory_space<vmem>>, vector<128x128xf32>
    %cst_14 = arith.constant dense<0.000000e+00> : vector<8x128xf32>
    %16 = tpu.matmul %14, %15, %cst_14 {dimension_numbers = #tpu.dot_dimension_numbers<[1], [0], [0], [1], [0, 0, 1, 1], [], []>} : vector<8x128xf32>, vector<128x128xf32>, vector<8x128xf32> -> vector<8x128xf32>
    %c0_15 = arith.constant 0 : index
    %c0_16 = arith.constant 0 : index
    %17 = vector.load %arg7[%c0_15, %c0_16] : memref<1x128xf32, #tpu.memory_space<vmem>>, vector<1x128xf32>
    %18 = vector.broadcast %17 : vector<1x128xf32> to vector<8x128xf32>
    %19 = arith.addf %16, %18 : vector<8x128xf32>
    %cst_17 = arith.constant 0.000000e+00 : f32
    %20 = vector.broadcast %cst_17 : f32 to vector<8x128xf32>
    %21 = arith.maximumf %19, %20 : vector<8x128xf32>
    %c0_18 = arith.constant 0 : index
    %c0_19 = arith.constant 0 : index
    %22 = vector.load %arg8[%c0_18, %c0_19] : memref<1x128xf32, #tpu.memory_space<vmem>>, vector<1x128xf32>
    %23 = vector.broadcast %22 : vector<1x128xf32> to vector<8x128xf32>
    %24 = arith.mulf %21, %23 : vector<8x128xf32>
    %cst_20 = arith.constant dense<0.000000e+00> : vector<8xf32>
    %25 = vector.multi_reduction <add>, %24, %cst_20 [1] : vector<8x128xf32> to vector<8xf32>
    %26 = vector.shape_cast %25 : vector<8xf32> to vector<8x1xf32>
    %c0_21 = arith.constant 0 : index
    %c0_22 = arith.constant 0 : index
    %27 = vector.load %arg9[%c0_21, %c0_22] : memref<1x1xf32, #tpu.memory_space<vmem>>, vector<1x1xf32>
    %28 = vector.broadcast %27 : vector<1x1xf32> to vector<8x1xf32>
    %29 = arith.addf %26, %28 : vector<8x1xf32>
    %c0_23 = arith.constant 0 : index
    %c0_24 = arith.constant 0 : index
    %30 = vector.load %arg10[%c0_23, %c0_24] : memref<8x1xf32, #tpu.memory_space<vmem>>, vector<8x1xf32>
    tpu.vector_store %arg10[%c0_23, %c0_24], %29 {strides = array<i32>} : memref<8x1xf32, #tpu.memory_space<vmem>>, vector<8x1xf32>,
    return
  }
  func.func @transform_0(%arg0: i32) -> (i32, i32) {
    %c0_i32 = arith.constant 0 : i32
    %c0_i32_0 = arith.constant 0 : i32
    return %arg0, %c0_i32 : i32, i32
  }
  func.func @transform_1(%arg0: i32) -> (i32, i32) {
    %c0_i32 = arith.constant 0 : i32
    %c0_i32_0 = arith.constant 0 : i32
    %c0_i32_1 = arith.constant 0 : i32
    return %c0_i32, %c0_i32_0 : i32, i32
  }
  func.func @transform_2(%arg0: i32) -> (i32, i32) {
    %c0_i32 = arith.constant 0 : i32
    %c0_i32_0 = arith.constant 0 : i32
    %c0_i32_1 = arith.constant 0 : i32
    return %c0_i32, %c0_i32_0 : i32, i32
  }
  func.func @transform_3(%arg0: i32) -> (i32, i32) {
    %c0_i32 = arith.constant 0 : i32
    %c0_i32_0 = arith.constant 0 : i32
    %c0_i32_1 = arith.constant 0 : i32
    return %c0_i32, %c0_i32_0 : i32, i32
  }
  func.func @transform_4(%arg0: i32) -> (i32, i32) {
    %c0_i32 = arith.constant 0 : i32
    %c0_i32_0 = arith.constant 0 : i32
    %c0_i32_1 = arith.constant 0 : i32
    return %c0_i32, %c0_i32_0 : i32, i32
  }
  func.func @transform_5(%arg0: i32) -> (i32, i32) {
    %c0_i32 = arith.constant 0 : i32
    %c0_i32_0 = arith.constant 0 : i32
    %c0_i32_1 = arith.constant 0 : i32
    return %c0_i32, %c0_i32_0 : i32, i32
  }
  func.func @transform_6(%arg0: i32) -> (i32, i32) {
    %c0_i32 = arith.constant 0 : i32
    %c0_i32_0 = arith.constant 0 : i32
    %c0_i32_1 = arith.constant 0 : i32
    return %c0_i32, %c0_i32_0 : i32, i32
  }
  func.func @transform_7(%arg0: i32) -> (i32, i32) {
    %c0_i32 = arith.constant 0 : i32
    %c0_i32_0 = arith.constant 0 : i32
    %c0_i32_1 = arith.constant 0 : i32
    return %c0_i32, %c0_i32_0 : i32, i32
  }
  func.func @transform_8(%arg0: i32) -> (i32, i32) {
    %c0_i32 = arith.constant 0 : i32
    %c0_i32_0 = arith.constant 0 : i32
    %c0_i32_1 = arith.constant 0 : i32
    return %c0_i32, %c0_i32_0 : i32, i32
  }
  func.func @transform_9(%arg0: i32) -> (i32, i32) {
    %c0_i32 = arith.constant 0 : i32
    %c0_i32_0 = arith.constant 0 : i32
    return %arg0, %c0_i32 : i32, i32
  }
}

</mosaic_0001>

<bundles_post_ra>
// kernel: tpu_custom_call.1
= control target key start
LH: loop header
LB: loop body
LE: loop exit
PB: predicated region body
PF: predicated region fallthrough
CT: control target
= control target key end

     0   :  { %s432_s0 = inlined_call_operand.hbm [shape: f32[8,5], index: 0, kind: input, shape index: {}]   ;;  %s433_s1 = inlined_call_operand.hbm [shape: f32[5,128], index: 1, kind: input, shape index: {}]   ;;  %s434_s2 = inlined_call_operand.vmem [shape: f32[1,128], index: 2, kind: input, shape index: {}]   ;;  %s435_s3 = inlined_call_operand.hbm [shape: f32[128,128], index: 3, kind: input, shape index: {}]   ;;  %s436_s4 = inlined_call_operand.vmem [shape: f32[1,128], index: 4, kind: input, shape index: {}]   ;;  %s437_s5 = inlined_call_operand.hbm [shape: f32[128,128], index: 5, kind: input, shape index: {}]   ;;  %s438_s6 = inlined_call_operand.vmem [shape: f32[1,128], index: 6, kind: input, shape index: {}]   ;;  %s439_s7 = inlined_call_operand.vmem [shape: f32[1,128], index: 7, kind: input, shape index: {}]   ;;  %s440_s8 = inlined_call_operand.<no memory space> [shape: f32[1,1], index: 8, kind: input, shape index: {}]   ;;  %s441_s9 = inlined_call_operand.vmem [shape: f32[8,1], index: 9, kind: output, shape index: {}]  }
   0x1   :  { %v14_v0 = vstv %s440_s8 }
   0x2   :  { %15 = vst [vmem:[#allocation2] sm:$0x1] %v14_v0 }
   0x3   :  { %16 = vsyncpa [#allocation4], 0 }
   0x4   :  { %17 = vsyncpa [#allocation6], 0  ;;  %s35_s13 = sshll.u32 %s433_s1, 4  ;;  %s36_s13 = int_to_ptr.hbm [resolvable:$true] %s35_s13 }
   0x5   :  { %18 = vsyncpa [#allocation9], 0  ;;  %s346_s14 = smov [#allocation5]   ;;  %s24_s18 = sshll.u32 %s432_s0, 4  ;;  %s25_s18 = int_to_ptr.hbm [resolvable:$true] %s24_s18 }
   0x6   :  { %s37_s15 = sshll.u32 %s346_s14, 4  ;;  %s347_s19 = smov [#allocation3]   ;;  %s38_s15 = int_to_ptr.vmem [resolvable:$true] %s37_s15 }
   0x7   :  { %40 = dma.hbm_to_vmem [thread:$0]  %s36_s13, 128, %s38_s15, [#allocation6]  }
   0x8   :  { %s26_s8 = sshll.u32 %s347_s19, 4  ;;  %s47_s22 = sshll.u32 %s435_s3, 4  ;;  %s27_s8 = int_to_ptr.vmem [resolvable:$true] %s26_s8  ;;  %s48_s22 = int_to_ptr.hbm [resolvable:$true] %s47_s22 }
   0x9   :  { %29 = dma.hbm_to_vmem [thread:$0]  %s25_s18, 128, %s27_s8, [#allocation4]  }
   0xa   :  { %s348_s1 = smov [#allocation7]   ;;  %s62_s26 = sshll.u32 %s437_s5, 4  ;;  %s63_s26 = int_to_ptr.hbm [resolvable:$true] %s62_s26 }
   0xb   :  { %s49_s23 = sshll.u32 %s348_s1, 4  ;;  %s349_s27 = smov 128   ;;  %s50_s23 = int_to_ptr.vmem [resolvable:$true] %s49_s23 }
   0xc   :  { %s350_s0 = smov 8   ;;  %s351_s28 = smov [#allocation8]  }
   0xd   :  { %55 = dma.hbm_to_vmem [thread:$0]  %s48_s22, 2048, %s50_s23, [#allocation6], %s349_s27, %s349_s27, %s350_s0  }
   0xe   :  { %s64_s29 = sshll.u32 %s351_s28, 4  ;;  %s65_s29 = int_to_ptr.vmem [resolvable:$true] %s64_s29 }
   0xf   :  { %70 = dma.hbm_to_vmem [thread:$0]  %s63_s26, 2048, %s65_s29, [#allocation9], %s349_s27, %s349_s27, %s350_s0  }
  0x10   :  { %340 = dma.done.wait [#allocation4], 128  }
  0x11   :  { %341 = vsyncadd [#allocation4], 4294967168 }
  0x12   :  { %342 = dma.done.wait [#allocation6], 2176  }
  0x13   :  { %343 = vsyncadd [#allocation6], 4294965120 }
  0x14   :  { %344 = dma.done.wait [#allocation9], 2048  }
  0x15   :  { %345 = vsyncadd [#allocation9], 4294965248  ;;  %vm103_vm0 = vcmask 1044480   ;;  %vm99_vm1 = vcmask 39936   ;;  %v94_v1 = vld [vmem:[#allocation5] sm:$0x1f] }
  0x16   :  { %v93_v2 = vld [vmem:[#allocation3] sm:$0xff]  ;;  %v143_v3 = vld [vmem:[#allocation7 + $0x78] sm:$0xff]  ;;  %231 = vmatpush.msk.msra.mxu0 %vm103_vm0, %v94_v1  ;;  %v141_v5 = vld [vmem:[#allocation7 + $0x68] sm:$0xff]  ;;  %vm222_vm2 = vcmask 7168  }
  0x17   :  { %148 = vmatpush.msra.mxu1 %v143_v3  ;;  %v142_v4 = vld [vmem:[#allocation7 + $0x70] sm:$0xff]  ;;  %232 = vmatmul.msk.f32.vlgmr.msra.gmra.mxu0 %vm99_vm1, %v93_v2  ;;  %v140_v6 = vld [vmem:[#allocation7 + $0x60] sm:$0xff]  ;;  %v139_v7 = vld [vmem:[#allocation7 + $0x58] sm:$0xff] }
  0x18   :  { %v138_v8 = vld [vmem:[#allocation7 + $0x50] sm:$0xff]  ;;  %v137_v9 = vld [vmem:[#allocation7 + $0x48] sm:$0xff]  ;;  %v136_v10 = vld [vmem:[#allocation7 + $0x40] sm:$0xff] }
  0x19   :  { %149 = vmatpush.msra.mxu1 %v142_v4  ;;  %v135_v11 = vld [vmem:[#allocation7 + $0x38] sm:$0xff]  ;;  %v134_v12 = vld [vmem:[#allocation7 + $0x30] sm:$0xff]  ;;  %v133_v13 = vld [vmem:[#allocation7 + $0x28] sm:$0xff] }
  0x1a   :  { %v132_v14 = vld [vmem:[#allocation7 + $0x20] sm:$0xff]  ;;  %v131_v15 = vld [vmem:[#allocation7 + $0x18] sm:$0xff]  ;;  %v130_v16 = vld [vmem:[#allocation7 + $0x10] sm:$0xff] }
  0x1b   :  { %150 = vmatpush.msra.mxu1 %v141_v5  ;;  %v129_v17 = vld [vmem:[#allocation7 + $0x8] sm:$0xff]  ;;  %v128_v18 = vld [vmem:[#allocation7] sm:$0xff]  ;;  %v184_v19 = vld [vmem:[#allocation8 + $0x78] sm:$0xff] }
  0x1c   :  { %v183_v20 = vld [vmem:[#allocation8 + $0x70] sm:$0xff]  ;;  %189 = vmatpush.msra.mxu2 %v184_v19  ;;  %v182_v21 = vld [vmem:[#allocation8 + $0x68] sm:$0xff]  ;;  %v181_v22 = vld [vmem:[#allocation8 + $0x60] sm:$0xff] }
  0x1d   :  { %151 = vmatpush.msra.mxu1 %v140_v6  ;;  %v180_v23 = vld [vmem:[#allocation8 + $0x58] sm:$0xff]  ;;  %v179_v24 = vld [vmem:[#allocation8 + $0x50] sm:$0xff]  ;;  %v178_v25 = vld [vmem:[#allocation8 + $0x48] sm:$0xff] }
  0x1e   :  { %190 = vmatpush.msra.mxu2 %v183_v20  ;;  %v177_v26 = vld [vmem:[#allocation8 + $0x40] sm:$0xff]  ;;  %v176_v27 = vld [vmem:[#allocation8 + $0x38] sm:$0xff]  ;;  %v175_v28 = vld [vmem:[#allocation8 + $0x30] sm:$0xff] }
  0x1f   :  { %152 = vmatpush.msra.mxu1 %v139_v7  ;;  %v174_v29 = vld [vmem:[#allocation8 + $0x28] sm:$0xff]  ;;  %v173_v30 = vld [vmem:[#allocation8 + $0x20] sm:$0xff]  ;;  %v172_v31 = vld [vmem:[#allocation8 + $0x18] sm:$0xff] }
  0x20   :  { %191 = vmatpush.msra.mxu2 %v182_v21  ;;  %v239_v32 = vld [vmem:[%s434_s2] ss:$0 sm:$0xff]  ;;  %v171_v36 = vld [vmem:[#allocation8 + $0x10] sm:$0xff]  ;;  %v169_v38 = vld [vmem:[#allocation8] sm:$0xff] }
  0x21   :  { %153 = vmatpush.msra.mxu1 %v138_v8  ;;  %v170_v37 = vld [vmem:[#allocation8 + $0x8] sm:$0xff] }
  0x22   :  { %192 = vmatpush.msra.mxu2 %v181_v22  ;;  %v240_v39 = vld [vmem:[%s436_s4] ss:$0 sm:$0xff] }
  0x23   :  { %154 = vmatpush.msra.mxu1 %v137_v9  ;;  %v241_v43 = vld [vmem:[%s438_s6] ss:$0 sm:$0xff] }
  0x24   :  { %193 = vmatpush.msra.mxu2 %v180_v23  ;;  %v242_v46 = vld [vmem:[%s439_s7] ss:$0 sm:$0xff] }
  0x25   :  { %155 = vmatpush.msra.mxu1 %v136_v10  ;;  %v243_v49 = vld [vmem:[#allocation2] ss:$0 sm:$0xff] }
  0x26   :  { %194 = vmatpush.msra.mxu2 %v179_v24 }
  0x27   :  { %156 = vmatpush.msra.mxu1 %v135_v11 }
  0x28   :  { %195 = vmatpush.msra.mxu2 %v178_v25 }
  0x29   :  { %157 = vmatpush.msra.mxu1 %v134_v12 }
  0x2a   :  { %196 = vmatpush.msra.mxu2 %v177_v26 }
  0x2b   :  { %158 = vmatpush.msra.mxu1 %v133_v13 }
  0x2c   :  { %197 = vmatpush.msra.mxu2 %v176_v27 }
  0x2d   :  { %159 = vmatpush.msra.mxu1 %v132_v14 }
  0x2e   :  { %198 = vmatpush.msra.mxu2 %v175_v28 }
  0x2f   :  { %160 = vmatpush.msra.mxu1 %v131_v15 }
  0x30   :  { %199 = vmatpush.msra.mxu2 %v174_v29 }
  0x31   :  { %161 = vmatpush.msra.mxu1 %v130_v16 }
  0x32   :  { %200 = vmatpush.msra.mxu2 %v173_v30 }
  0x33   :  { %162 = vmatpush.msra.mxu1 %v129_v17 }
  0x34   :  { %201 = vmatpush.msra.mxu2 %v172_v31 }
  0x35   :  { %163 = vmatpush.msra.mxu1 %v128_v18 }
  0x36   :  { %202 = vmatpush.msra.mxu2 %v171_v36 }
  0x38   :  { %203 = vmatpush.msra.mxu2 %v170_v37 }
  0x3a   :  { %204 = vmatpush.msra.mxu2 %v169_v38 }
  0x94   :  { %v124_v33 = vpop.f32.mrf.mxu0 }
  0x95   :  { %v125_v34 = vadd.f32 %v239_v32, %v124_v33 }
  0x97   :  { %v127_v35 = vmax.f32 %v125_v34, 0.0 }
  0x99   :  { %164 = vmatmul.f32.vlgmr.msra.gmra.mxu1 %v127_v35 }
 0x116   :  { %v165_v40 = vpop.f32.mrf.mxu1 }
 0x117   :  { %v166_v41 = vadd.f32 %v240_v39, %v165_v40 }
 0x119   :  { %v168_v42 = vmax.f32 %v166_v41, 0.0 }
 0x11b   :  { %205 = vmatmul.f32.vlgmr.msra.gmra.mxu2 %v168_v42 }
 0x19e   :  { %v206_v44 = vpop.f32.mrf.mxu2 }
 0x19f   :  { %v207_v45 = vadd.f32 %v241_v43, %v206_v44 }
 0x1a1   :  { %v209_v47 = vmax.f32 %v207_v45, 0.0 }
 0x1a3   :  { %v214_v48 = vmul.f32 %v242_v46, %v209_v47 }
 0x1a5   :  { %215 = vadd.xlane.f32.xlu0 %v214_v48 }
 0x218   :  { %v216_v50 = vpop.xlane.xlu0 %215 }
 0x219   :  { %v221_v51 = vadd.f32 %v243_v49, %v216_v50 }
 0x21b   :  { %223 = vst.msk [vmem:[%s441_s9] sm:$0xff] %vm222_vm2, %v221_v51 }
 0x21c   :  { %228 = vsyncpa [#allocation4], 1 }
 0x21d   :  { %229 = vsyncpa [#allocation6], 1 }
 0x21e   :  { %230 = vsyncpa [#allocation9], 1 }

</bundles_post_ra>
